<compile_context>
chip_gen: v7x
topology: tpu7x:2x2x1
jax: 0.10.0
libtpu: 0.0.40
codegen_flags: <defaults>
</compile_context>

<pallas_src>
import functools
import itertools

import jax
import jax.numpy as jnp
import numpy as np
from jax.experimental import pallas as pl
from jax.experimental.pallas import tpu as pltpu


def _round_up(x, m):
    return ((x + m - 1) // m) * m


def _cost_kernel(sizes_ref, prob_ref, x_ref, rhs_cls_ref, rhs_dst_ref, out_ref,
                 *, tt, cost_class, cost_point):
    """One (query-tile, target-tile) block of batch b's cost matrix.

    sizes_ref   : SMEM [B]  per-batch true target counts (scalar prefetch)
    prob_ref    : [TQ, Cp]  softmax(pred_logits), bf16, padded class lanes = 0
    x_ref       : [TQ, Kp]  f32 lanes 0..3 = (px, py, px^2+py^2, 1), rest 0
    rhs_cls_ref : [Cp, TT]  bf16, rows 0..C-1 = one_hot(tgt label)^T, rest 0
    rhs_dst_ref : [Kp, TT]  f32, rows 0..3 = (-2*tx, -2*ty, 1, tx^2+ty^2), rest 0
    out_ref     : [TQ, TT]  bf16 cost block
    """
    b = pl.program_id(0)
    ti = pl.program_id(2)
    n_b = sizes_ref[b]

    @pl.when(ti * tt >= n_b)
    def _():
        # Whole target tile is padding for this batch element: skip the MXU work.
        out_ref[...] = jnp.zeros_like(out_ref)

    @pl.when(ti * tt < n_b)
    def _():
        # -prob[:, tgt_ids] as a one-hot matmul on the MXU (bf16 in, f32 accumulate).
        c_class = jnp.dot(prob_ref[...], rhs_cls_ref[...],
                          preferred_element_type=jnp.float32)
        # |p - t|^2 = |p|^2 - 2 p.t + |t|^2 as one f32 MXU matmul; clamp before sqrt
        # against rounding-induced tiny negatives.
        d2 = jnp.dot(x_ref[...], rhs_dst_ref[...],
                     preferred_element_type=jnp.float32)
        c_point = jnp.sqrt(jnp.maximum(d2, 0.0))
        out_ref[...] = (cost_point * c_point
                        - cost_class * c_class).astype(out_ref.dtype)


def compute_cost_matrices(pred_logits, pred_points, targets,
                          cost_class=1.0, cost_point=1.0,
                          max_tq=1024, max_tt=2048):
    """Padded per-batch cost tensor [B, Q_pad, T_pad] (bf16); real part [:, :Q, :sizes[b]]."""
    B, Q, C = pred_logits.shape
    sizes = [int(v["point"].shape[0]) for v in targets]
    T_max = max(sizes) if sizes else 0
    if T_max == 0:
        return None, sizes

    f32, bf16 = jnp.float32, jnp.bfloat16
    C_pad = _round_up(C, 128)        # class lanes
    K_pts = 128                      # (px, py, |p|^2, 1) + zero padding lanes

    # NOTE: for production anchor counts, pad queries to >= 256 so the MXU rows are
    # fully occupied; the demo Q=8 only exercises a sliver of the systolic array.
    Q_pad = _round_up(max(Q, 8), 8)
    TQ = min(max_tq, Q_pad)
    Q_pad = _round_up(Q_pad, TQ)

    T_pad = _round_up(max(T_max, 128), 128)
    TT = min(max_tt, T_pad)
    T_pad = _round_up(T_pad, TT)

    pts = pred_points.astype(f32)

    # Class-probability LHS, computed once in the wrapper (tiny vs the matmuls) so
    # the kernel carries no cross-iteration state and all grid axes stay parallel.
    prob_full = jax.nn.softmax(pred_logits.astype(f32), axis=-1)       # [B, Q, C]
    prob = jnp.zeros((B, Q_pad, C_pad), bf16)
    prob = prob.at[:, :Q, :C].set(prob_full.astype(bf16))

    # Distance LHS stays f32 (precision of the squared-distance expansion).
    x = jnp.zeros((B, Q_pad, K_pts), f32)
    x = x.at[:, :Q, 0].set(pts[..., 0])
    x = x.at[:, :Q, 1].set(pts[..., 1])
    x = x.at[:, :Q, 2].set(pts[..., 0] ** 2 + pts[..., 1] ** 2)
    x = x.at[:, :Q, 3].set(1.0)

    # Per-batch RHS matrices (block-diagonal). Padded target columns stay zero.
    rhs_cls = jnp.zeros((B, C_pad, T_pad), bf16)
    rhs_dst = jnp.zeros((B, K_pts, T_pad), f32)
    for b, tgt in enumerate(targets):
        nb = sizes[b]
        if nb == 0:
            continue
        lab = jnp.asarray(tgt["labels"])
        tp = jnp.asarray(tgt["point"]).astype(f32)
        onehot = jax.nn.one_hot(lab, C, dtype=f32)                      # [nb, C]
        rhs_cls = rhs_cls.at[b, :C, :nb].set(onehot.T.astype(bf16))
        tx, ty = tp[:, 0], tp[:, 1]
        rhs_dst = rhs_dst.at[b, 0, :nb].set(-2.0 * tx)
        rhs_dst = rhs_dst.at[b, 1, :nb].set(-2.0 * ty)
        rhs_dst = rhs_dst.at[b, 2, :nb].set(1.0)
        rhs_dst = rhs_dst.at[b, 3, :nb].set(tx * tx + ty * ty)

    sizes_arr = jnp.asarray(sizes, dtype=jnp.int32)

    kernel = functools.partial(_cost_kernel, tt=TT,
                               cost_class=float(cost_class),
                               cost_point=float(cost_point))

    grid = (B, Q_pad // TQ, T_pad // TT)
    qi_steps = Q_pad // TQ
    flops = 2 * B * Q_pad * T_pad * (C_pad + K_pts)                     # two MXU matmuls
    transcendentals = B * Q_pad * T_pad                                 # sqrt
    # Accounts for RHS re-fetch across query tiles (qi_steps factor).
    bytes_accessed = (2 * B * Q_pad * C_pad                             # prob (bf16)
                      + 4 * B * Q_pad * K_pts                           # x (f32)
                      + qi_steps * B * T_pad * (2 * C_pad + 4 * K_pts)  # rhs_cls + rhs_dst
                      + 2 * B * Q_pad * T_pad)                          # out (bf16)

    out = pl.pallas_call(
        kernel,
        out_shape=jax.ShapeDtypeStruct((B, Q_pad, T_pad), jnp.bfloat16),
        grid_spec=pltpu.PrefetchScalarGridSpec(
            num_scalar_prefetch=1,
            grid=grid,
            in_specs=[
                pl.BlockSpec((None, TQ, C_pad), lambda b, qi, ti, sz: (b, qi, 0)),
                pl.BlockSpec((None, TQ, K_pts), lambda b, qi, ti, sz: (b, qi, 0)),
                pl.BlockSpec((None, C_pad, TT), lambda b, qi, ti, sz: (b, 0, ti)),
                pl.BlockSpec((None, K_pts, TT), lambda b, qi, ti, sz: (b, 0, ti)),
            ],
            out_specs=pl.BlockSpec((None, TQ, TT),
                                   lambda b, qi, ti, sz: (b, qi, ti)),
        ),
        compiler_params=pltpu.CompilerParams(
            # No cross-iteration state -> every axis parallel (v7x megacore-friendly).
            dimension_semantics=("parallel", "parallel", "parallel"),
            # Lifts v5e's 16 MiB scoped default; stays within v7x's 64 MiB physical VMEM.
            vmem_limit_bytes=32 * 1024 * 1024,
        ),
        cost_estimate=pl.CostEstimate(flops=flops,
                                      transcendentals=transcendentals,
                                      bytes_accessed=bytes_accessed),
    )(sizes_arr, prob, x, rhs_cls, rhs_dst)
    return out, sizes


def _linear_sum_assignment_small(c):
    """Exact min-cost assignment for a small Q x T cost matrix (Q >= T)."""
    # TODO(synk): Hungarian algorithm (scipy.linear_sum_assignment) has no Pallas
    # equivalent; this exact brute-force runs on host for small problem sizes.
    Q, T = c.shape
    if T == 0:
        return np.zeros((0,), np.int64), np.zeros((0,), np.int64)
    assert Q >= T, "matcher assumes more predictions than targets"
    best_perm, best_cost = None, np.inf
    for perm in itertools.permutations(range(Q), T):
        cost = sum(c[perm[j], j] for j in range(T))
        if cost < best_cost:
            best_cost, best_perm = cost, perm
    pairs = sorted(zip(best_perm, range(T)))
    i = np.array([p[0] for p in pairs], dtype=np.int64)
    j = np.array([p[1] for p in pairs], dtype=np.int64)
    return i, j


class HungarianMatcherCrowd:
    """JAX/Pallas port of HungarianMatcher_Crowd (no learned parameters)."""

    def __init__(self, cost_class: float = 1.0, cost_point: float = 1.0):
        assert cost_class != 0 or cost_point != 0, "all costs cant be 0"
        self.cost_class = cost_class
        self.cost_point = cost_point

    def __call__(self, outputs, targets):
        bs, num_queries = outputs["pred_logits"].shape[:2]
        out, sizes = compute_cost_matrices(
            outputs["pred_logits"], outputs["pred_points"], targets,
            cost_class=self.cost_class, cost_point=self.cost_point)
        if out is None:  # no targets at all
            empty = np.zeros((0,), np.int64)
            return [(empty, empty) for _ in range(bs)]
        C_pad = np.asarray(jax.block_until_ready(out.astype(jnp.float32)))
        indices = []
        for b in range(bs):
            c = C_pad[b, :num_queries, :sizes[b]]
            indices.append(_linear_sum_assignment_small(c))
        return indices


if __name__ == "__main__":
    key = jax.random.PRNGKey(0)
    B, Q, NUM_CLASSES = 2, 8, 2
    k1, k2, k3, k4 = jax.random.split(key, 4)

    outputs = {
        "pred_logits": jax.random.normal(k1, (B, Q, NUM_CLASSES), jnp.float32),
        "pred_points": jax.random.uniform(k2, (B, Q, 2), jnp.float32) * 128.0,
    }
    targets = [
        {"labels": jnp.ones((3,), jnp.int32),
         "point": jax.random.uniform(k3, (3, 2), jnp.float32) * 128.0},
        {"labels": jnp.ones((4,), jnp.int32),
         "point": jax.random.uniform(k4, (4, 2), jnp.float32) * 128.0},
    ]

    # Run the Pallas kernel and validate its cost blocks against a plain-JAX ref.
    out_pad, sizes = compute_cost_matrices(
        outputs["pred_logits"], outputs["pred_points"], targets, 1.0, 1.0)
    out_pad = np.asarray(jax.block_until_ready(out_pad.astype(jnp.float32)))

    prob = jax.nn.softmax(outputs["pred_logits"].reshape(B * Q, NUM_CLASSES), -1)
    pts = outputs["pred_points"].reshape(B * Q, 2)
    for b in range(B):
        tp = targets[b]["point"]
        lab = targets[b]["labels"]
        pb = prob[b * Q:(b + 1) * Q]
        xb = pts[b * Q:(b + 1) * Q]
        dist = jnp.sqrt(jnp.sum((xb[:, None, :] - tp[None, :, :]) ** 2, axis=-1))
        ref = 1.0 * dist - 1.0 * pb[:, lab]
        got = out_pad[b, :Q, :sizes[b]]
        # bf16 output + bf16 class matmul: ~0.4% relative rounding on the cost values.
        np.testing.assert_allclose(got, np.asarray(ref), rtol=2e-2, atol=2e-1)

    matcher = HungarianMatcherCrowd(cost_class=1.0, cost_point=1.0)
    result = matcher(outputs, targets)

    # Sanity checks on the matcher contract.
    for b, (i, j) in enumerate(result):
        n = targets[b]["point"].shape[0]
        assert len(i) == len(j) == min(Q, n)
        assert len(set(i.tolist())) == len(i)

    print("KERNEL_OK")
</pallas_src>

<mosaic_0001>
module attributes {stable_mosaic.version = 11 : i64} {
  func.func @_cost_kernel(%arg0: i32, %arg1: i32, %arg2: i32, %arg3: memref<2xi32, #tpu.memory_space<smem>>, %arg4: memref<1x8x128xbf16, #tpu.memory_space<vmem>>, %arg5: memref<1x8x128xf32, #tpu.memory_space<vmem>>, %arg6: memref<1x128x128xbf16, #tpu.memory_space<vmem>>, %arg7: memref<1x128x128xf32, #tpu.memory_space<vmem>>, %arg8: memref<1x8x128xbf16, #tpu.memory_space<vmem>>) attributes {dimension_semantics = [#tpu.dimension_semantics<parallel>, #tpu.dimension_semantics<parallel>, #tpu.dimension_semantics<parallel>], iteration_bounds = array<i64: 2, 1, 1>, scalar_prefetch = 1 : i64, scratch_operands = 0 : i64, tpu.core_type = #tpu.core_type<tc>, window_params = [{transform_indices = @transform_0, window_bounds = array<i64: 1, 8, 128>}, {transform_indices = @transform_1, window_bounds = array<i64: 1, 8, 128>}, {transform_indices = @transform_2, window_bounds = array<i64: 1, 128, 128>}, {transform_indices = @transform_3, window_bounds = array<i64: 1, 128, 128>}, {transform_indices = @transform_4, window_bounds = array<i64: 1, 8, 128>}]} {
    %0 = arith.index_cast %arg0 : i32 to index
    %1 = memref.load %arg3[%0] : memref<2xi32, #tpu.memory_space<smem>>
    %c128_i32 = arith.constant 128 : i32
    %2 = arith.muli %arg2, %c128_i32 : i32
    %3 = arith.cmpi sge, %2, %1 : i32
    %4 = arith.extui %3 : i1 to i32
    %c0_i32 = arith.constant 0 : i32
    %5 = arith.cmpi ne, %4, %c0_i32 : i32
    scf.if %5 {
      %cst = arith.constant 0.000000e+00 : bf16
      %10 = vector.broadcast %cst : bf16 to vector<8x128xbf16>
      %c0 = arith.constant 0 : index
      %c0_2 = arith.constant 0 : index
      %c0_3 = arith.constant 0 : index
      %11 = vector.load %arg8[%c0, %c0_2, %c0_3] : memref<1x8x128xbf16, #tpu.memory_space<vmem>>, vector<1x8x128xbf16>
      %12 = vector.shape_cast %11 : vector<1x8x128xbf16> to vector<8x128xbf16>
      %13 = vector.shape_cast %10 : vector<8x128xbf16> to vector<1x8x128xbf16>
      tpu.vector_store %arg8[%c0, %c0_2, %c0_3], %13 {strides = array<i32>} : memref<1x8x128xbf16, #tpu.memory_space<vmem>>, vector<1x8x128xbf16>,
    } else {
    }
    %c128_i32_0 = arith.constant 128 : i32
    %6 = arith.muli %arg2, %c128_i32_0 : i32
    %7 = arith.cmpi slt, %6, %1 : i32
    %8 = arith.extui %7 : i1 to i32
    %c0_i32_1 = arith.constant 0 : i32
    %9 = arith.cmpi ne, %8, %c0_i32_1 : i32
    scf.if %9 {
      %c0 = arith.constant 0 : index
      %c0_2 = arith.constant 0 : index
      %c0_3 = arith.constant 0 : index
      %10 = vector.load %arg4[%c0, %c0_2, %c0_3] : memref<1x8x128xbf16, #tpu.memory_space<vmem>>, vector<1x8x128xbf16>
      %11 = vector.shape_cast %10 : vector<1x8x128xbf16> to vector<8x128xbf16>
      %c0_4 = arith.constant 0 : index
      %c0_5 = arith.constant 0 : index
      %c0_6 = arith.constant 0 : index
      %12 = vector.load %arg6[%c0_4, %c0_5, %c0_6] : memref<1x128x128xbf16, #tpu.memory_space<vmem>>, vector<1x128x128xbf16>
      %13 = vector.shape_cast %12 : vector<1x128x128xbf16> to vector<128x128xbf16>
      %cst = arith.constant dense<0.000000e+00> : vector<8x128xf32>
      %14 = tpu.matmul %11, %13, %cst {dimension_numbers = #tpu.dot_dimension_numbers<[1], [0], [0], [1], [0, 0, 1, 1], [], []>} : vector<8x128xbf16>, vector<128x128xbf16>, vector<8x128xf32> -> vector<8x128xf32>
      %c0_7 = arith.constant 0 : index
      %c0_8 = arith.constant 0 : index
      %c0_9 = arith.constant 0 : index
      %15 = vector.load %arg5[%c0_7, %c0_8, %c0_9] : memref<1x8x128xf32, #tpu.memory_space<vmem>>, vector<1x8x128xf32>
      %16 = vector.shape_cast %15 : vector<1x8x128xf32> to vector<8x128xf32>
      %c0_10 = arith.constant 0 : index
      %c0_11 = arith.constant 0 : index
      %c0_12 = arith.constant 0 : index
      %17 = vector.load %arg7[%c0_10, %c0_11, %c0_12] : memref<1x128x128xf32, #tpu.memory_space<vmem>>, vector<1x128x128xf32>
      %18 = vector.shape_cast %17 : vector<1x128x128xf32> to vector<128x128xf32>
      %cst_13 = arith.constant dense<0.000000e+00> : vector<8x128xf32>
      %19 = tpu.matmul %16, %18, %cst_13 {dimension_numbers = #tpu.dot_dimension_numbers<[1], [0], [0], [1], [0, 0, 1, 1], [], []>} : vector<8x128xf32>, vector<128x128xf32>, vector<8x128xf32> -> vector<8x128xf32>
      %cst_14 = arith.constant 0.000000e+00 : f32
      %20 = vector.broadcast %cst_14 : f32 to vector<8x128xf32>
      %21 = arith.maximumf %19, %20 : vector<8x128xf32>
      %22 = math.sqrt %21 : vector<8x128xf32>
      %cst_15 = arith.constant 1.000000e+00 : f32
      %23 = vector.broadcast %cst_15 : f32 to vector<8x128xf32>
      %24 = arith.mulf %23, %22 : vector<8x128xf32>
      %cst_16 = arith.constant 1.000000e+00 : f32
      %25 = vector.broadcast %cst_16 : f32 to vector<8x128xf32>
      %26 = arith.mulf %25, %14 : vector<8x128xf32>
      %27 = arith.subf %24, %26 : vector<8x128xf32>
      %28 = arith.truncf %27 : vector<8x128xf32> to vector<8x128xbf16>
      %c0_17 = arith.constant 0 : index
      %c0_18 = arith.constant 0 : index
      %c0_19 = arith.constant 0 : index
      %29 = vector.load %arg8[%c0_17, %c0_18, %c0_19] : memref<1x8x128xbf16, #tpu.memory_space<vmem>>, vector<1x8x128xbf16>
      %30 = vector.shape_cast %29 : vector<1x8x128xbf16> to vector<8x128xbf16>
      %31 = vector.shape_cast %28 : vector<8x128xbf16> to vector<1x8x128xbf16>
      tpu.vector_store %arg8[%c0_17, %c0_18, %c0_19], %31 {strides = array<i32>} : memref<1x8x128xbf16, #tpu.memory_space<vmem>>, vector<1x8x128xbf16>,
    } else {
    }
    return
  }
  func.func @transform_0(%arg0: i32, %arg1: i32, %arg2: i32, %arg3: memref<2xi32, #tpu.memory_space<smem>>) -> (i32, i32, i32) {
    %c0_i32 = arith.constant 0 : i32
    %c0_i32_0 = arith.constant 0 : i32
    return %arg0, %arg1, %c0_i32 : i32, i32, i32
  }
  func.func @transform_1(%arg0: i32, %arg1: i32, %arg2: i32, %arg3: memref<2xi32, #tpu.memory_space<smem>>) -> (i32, i32, i32) {
    %c0_i32 = arith.constant 0 : i32
    %c0_i32_0 = arith.constant 0 : i32
    return %arg0, %arg1, %c0_i32 : i32, i32, i32
  }
  func.func @transform_2(%arg0: i32, %arg1: i32, %arg2: i32, %arg3: memref<2xi32, #tpu.memory_space<smem>>) -> (i32, i32, i32) {
    %c0_i32 = arith.constant 0 : i32
    %c0_i32_0 = arith.constant 0 : i32
    return %arg0, %c0_i32, %arg2 : i32, i32, i32
  }
  func.func @transform_3(%arg0: i32, %arg1: i32, %arg2: i32, %arg3: memref<2xi32, #tpu.memory_space<smem>>) -> (i32, i32, i32) {
    %c0_i32 = arith.constant 0 : i32
    %c0_i32_0 = arith.constant 0 : i32
    return %arg0, %c0_i32, %arg2 : i32, i32, i32
  }
  func.func @transform_4(%arg0: i32, %arg1: i32, %arg2: i32, %arg3: memref<2xi32, #tpu.memory_space<smem>>) -> (i32, i32, i32) {
    %c0_i32 = arith.constant 0 : i32
    return %arg0, %arg1, %arg2 : i32, i32, i32
  }
}

</mosaic_0001>

<bundles_post_ra>
// kernel: tpu_custom_call.1
= control target key start
LH: loop header
LB: loop body
LE: loop exit
PB: predicated region body
PF: predicated region fallthrough
CT: control target
= control target key end

     0   :  { %s1601_s0 = inlined_call_operand.hbm [shape: s32[2], index: 0, kind: input, shape index: {}]   ;;  %s1602_s1 = inlined_call_operand.hbm [shape: bf16[2,8,128], index: 1, kind: input, shape index: {}]   ;;  %s1603_s2 = inlined_call_operand.hbm [shape: f32[2,8,128], index: 2, kind: input, shape index: {}]   ;;  %s1604_s3 = inlined_call_operand.hbm [shape: bf16[2,128,128], index: 3, kind: input, shape index: {}]   ;;  %s1605_s4 = inlined_call_operand.hbm [shape: f32[2,128,128], index: 4, kind: input, shape index: {}]   ;;  %s1606_s5 = inlined_call_operand.hbm [shape: bf16[2,8,128], index: 5, kind: output, shape index: {}]  }
   0x1   :  { %1612 = sst [smem:[#allocation20_spill]] %s1602_s1  ;;  %s992_s20 = scalar_lea.hbm %s1601_s0, 16 }
   0x2   :  { %1613 = sst [smem:[#allocation21_spill]] %s1603_s2  ;;  %p993_p0 = scmp.ne.s32.totalorder %s1601_s0, %s992_s20 }
   0x3   :  { %p996_p1 = scmp.lt.u32.totalorder %s992_s20, %s1601_s0 }
   0x5   :  { %p998_p2 = pnand %p996_p1, %p993_p0 }
   0x7   :  { %1001 = shalt.err (!%p998_p2)  }
   0x8   :  { %s1216_s25 = smov [#allocation3]  }
   0x9   :  { %11 = dma.hbm_to_smem %s1601_s0, 16, %s1216_s25, [#allocation2] }
   0xa   :  { %1174 = dma.done.wait [#allocation2], 16 }
   0xb   :  { %1175 = vsyncadd [#allocation2], 4294967280 }
   0xc   :  { %13 = sfence }
   0xd   :  { %14 = vsyncpa [#allocation5], 0 }
   0xe   :  { %16 = vsyncpa [#allocation5 + $0x1], 0 }
   0xf   :  { %17 = vsyncpa [#allocation8], 0 }
  0x10   :  { %19 = vsyncpa [#allocation8 + $0x1], 0 }
  0x11   :  { %20 = vsyncpa [#allocation11], 0 }
  0x12   :  { %22 = vsyncpa [#allocation11 + $0x1], 0 }
  0x13   :  { %23 = vsyncpa [#allocation6], 0 }
  0x14   :  { %25 = vsyncpa [#allocation6 + $0x1], 0  ;;  %s1272_s28 = smov 0   ;;  %s1274_s29 = smov 0  }
  0x15   :  { %s1276_s30 = smov 0   ;;  %s1278_s6 = smov 0  }
  0x16   :  { %s1280_s0 = smov 0   ;;  %s1282_s7 = smov 0  }
  0x17 LB: > { %s1303_s8 = sadd.s32 4294967295, %s1214_s7   ;;  %s754_s9 = sadd.s32 4294967294, %s1214_s7   ;;  %s1214_s7 = sphi %s1282_s7, %s31_s7   ;;  %s1210_s0 = sphi %s1280_s0, %s1640_s0   ;;  %s1206_s6 = sphi %s1278_s6, %s1639_s6   ;;  %s1202_s30 = sphi %s1276_s30, %s1638_s30   ;;  %s1198_s29 = sphi %s1274_s29, %s1637_s29   ;;  %s1194_s28 = sphi %s1272_s28, %s1636_s28  }
  0x18   : > { %s50_s10 = sadd.s32 1, %s1210_s0  ;;  %s59_s11 = sadd.s32 1, %s1202_s30 }
  0x19   : > { %p52_p3 = scmp.ge.s32.totalorder %s50_s10, 2  ;;  %p66_p4 = scmp.ne.s32.totalorder %s1202_s30, %s1198_s29 }
  0x1a   : > { %p67_p5 = scmp.eq.s32.totalorder %s1214_s7, 0  ;;  %p72_p6 = scmp.ne.s32.totalorder %s1198_s29, %s1194_s28 }
  0x1b   : > { %s1642_s10 = smov (%p52_p3, %s50_s10), 0  ;;  %p73_p8 = scmp.eq.s32.totalorder %s1303_s8, 0 }
  0x1c   : > { %1614 = sst [smem:[#allocation18_spill]] %s1642_s10  ;;  %p1315_p7 = por %p67_p5, %p66_p4 }
  0x1d   : > { %s54_s13 = ssub.s32 %s1210_s0, %s1642_s10  ;;  %p184_p9 = scmp.eq.s32.totalorder %s1303_s8, 1 }
  0x1e   : > { %p57_p10 = scmp.eq.s32.totalorder %s54_s13, 0  ;;  %p1323_p11 = por %p73_p8, %p72_p6 }
  0x1f   : > { %p1327_p12 = por %p184_p9, %p66_p4  ;;  %p190_p13 = scmp.eq.s32.totalorder %s754_s9, 1 }
  0x20   : > { %s1616_s14 = scalar_select %p1323_p11, 1, 0 }
  0x21   : > { %s1617_s15 = scalar_select %p1327_p12, 1, 0 }
  0x22   : > { %s1332_s16 = scalar_select %p57_p10, %s1202_s30, %s59_s11  }
  0x23   : > { %p1334_p0 = por %p190_p13, %p72_p6  ;;  %p923_p2 = scmp.lt.s32.totalorder %s1214_s7, 2 }
  0x24   : > { %1618 = sst [smem:[#allocation19_spill]] %s1332_s16  ;;  %s1341_s18 = sand.u32 1, %s1202_s30  }
  0x25   : > { %s1619_s17 = scalar_select %p1334_p0, 1, 0 }
  0x26   : > { %s229_s19 = sand.u32 1, %s1214_s7   ;;  %s759_s20 = sshll.u32 %s1341_s18, 3 }
  0x27   : > { %p1347_p3 = pnand %p923_p2, %p1315_p7  ;;  %s760_s22 = sshll.u32 %s1210_s0, 7 }
  0x28   : > { %s1621_s2 = sld [smem:[#allocation21_spill]]  ;;  %s233_s26 = scalar_lea.vmem [#allocation7], %s759_s20 }
  0x29   : > { %s1620_s21 = scalar_select %p1347_p3, 1, 0 }
  0x2a   : > { %s241_s27 = sshll.u32 %s233_s26, 4  ;;  %s1361_s9 = scalar_lea.sflag [#allocation8], %s229_s19  ;;  %s1358_s27 = int_to_ptr.vmem [resolvable:$true] %s241_s27 }
  0x2b   : > { %p1367_p7 = pneg %p1347_p3 }
  0x2e   : > { %s1355_s25 = scalar_lea.hbm %s1621_s2, %s760_s22  ;;  %s1007_s22 = scalar_lea.hbm %s1621_s2, 256 }
  0x2f   : > { %s1002_s11 = scalar_lea.hbm %s1355_s25, 128  ;;  %p1008_p10 = scmp.lt.u32.totalorder %s1355_s25, %s1621_s2 }
  0x30   : > { %p1003_p6 = scmp.ne.s32.totalorder %s1355_s25, %s1002_s11  ;;  %p1009_p13 = scmp.lt.u32.totalorder %s1007_s22, %s1002_s11 }
  0x31   : > { %p1011_p1 = scmp.lt.u32.totalorder %s1002_s11, %s1355_s25 }
  0x32   : > { %p1005_p8 = pnand %p1367_p7, %p1003_p6  ;;  %p1010_p2 = por %p1009_p13, %p1008_p10 }
  0x34   : > { %p1006_p9 = pneg %p1005_p8  ;;  %p1012_p4 = por %p1011_p1, %p1010_p2 }
  0x36   : > { %p1013_p5 = pnand %p1012_p4, %p1006_p9 }
  0x38   : > { %1016 = shalt.err (!%p1013_p5)
}
  0x39   : > { %s1017_s19 = scalar_lea.vmem %s1358_s27, 128  ;;  %s1217_s26 = smov [#allocation7]  }
  0x3a   : > { %p1018_p6 = scmp.ne.s32.totalorder %s1358_s27, %s1017_s19  ;;  %s1022_s13 = sshll.u32 %s1217_s26, 4  ;;  %s1023_s13 = int_to_ptr.vmem [resolvable:$false] %s1022_s13 }
  0x3b   : > { %s1024_s20 = scalar_lea.vmem %s1023_s13, 256  ;;  %p1025_p12 = scmp.lt.s32.totalorder %s1358_s27, %s1023_s13 }
  0x3c   : > { %p1020_p8 = pnand %p1018_p6, %p1367_p7  ;;  %p1026_p11 = scmp.lt.s32.totalorder %s1024_s20, %s1017_s19 }
  0x3e   : > { %p1021_p0 = pneg %p1020_p8  ;;  %p1027_p10 = por %p1026_p11, %p1025_p12 }
  0x40   : > { %p1028_p13 = pnand %p1027_p10, %p1021_p0 }
  0x42   : > { %1031 = shalt.err (!%p1028_p13)
}
  0x43   : > { %912 = dma.hbm_to_vmem [thread:$0]  (!%p1347_p3), %s1355_s25, 128, %s1358_s27, %s1361_s9  }
  0x44   : > { %p1623_p1 = scmp.lt.s32.totalorder %s1214_s7, 3  ;;  %p1624_p4 = scmp.ge.s32.totalorder %s1214_s7, 1 }
  0x45   : > { %s757_s22 = sshll.u32 %s1341_s18, 2  ;;  %s758_s23 = sshll.u32 %s1210_s0, 6 }
  0x46   : > { %p1395_p5 = pnand %p1624_p4, %p1623_p1  ;;  %s1626_s1 = sld [smem:[#allocation20_spill]] }
  0x47   : > { %s214_s13 = scalar_lea.vmem [#allocation4], %s757_s22  ;;  %s211_s27 = scalar_lea.sflag [#allocation5], %s1341_s18 }
  0x48   : > { %s1625_s11 = scalar_select %p1395_p5, 1, 0 }
  0x49   : > { %s222_s20 = sshll.u32 %s214_s13, 4  ;;  %s223_s20 = int_to_ptr.vmem [resolvable:$true] %s222_s20 }
  0x4c   : > { %s1404_s26 = scalar_lea.hbm %s1626_s1, %s758_s23  ;;  %s1037_s24 = scalar_lea.hbm %s1626_s1, 128 }
  0x4d   : > { %s1032_s2 = scalar_lea.hbm %s1404_s26, 64  ;;  %p1038_p9 = scmp.lt.u32.totalorder %s1404_s26, %s1626_s1 }
  0x4e   : > { %p1033_p11 = scmp.ne.s32.totalorder %s1404_s26, %s1032_s2  ;;  %p1039_p2 = scmp.lt.u32.totalorder %s1037_s24, %s1032_s2 }
  0x4f   : > { %p1041_p8 = scmp.lt.u32.totalorder %s1032_s2, %s1404_s26 }
  0x50   : > { %p1035_p12 = pnand %p1033_p11, %p1367_p7  ;;  %p1040_p6 = por %p1039_p2, %p1038_p9 }
  0x52   : > { %p1036_p0 = pneg %p1035_p12  ;;  %p1042_p10 = por %p1041_p8, %p1040_p6 }
  0x54   : > { %p1043_p13 = pnand %p1042_p10, %p1036_p0 }
  0x56   : > { %1046 = shalt.err (!%p1043_p13)
}
  0x57   : > { %s1047_s22 = scalar_lea.vmem %s223_s20, 64  ;;  %s1218_s13 = smov [#allocation4]  }
  0x58   : > { %p1048_p1 = scmp.ne.s32.totalorder %s223_s20, %s1047_s22  ;;  %s1052_s25 = sshll.u32 %s1218_s13, 4  ;;  %s1053_s25 = int_to_ptr.vmem [resolvable:$false] %s1052_s25 }
  0x59   : > { %s1054_s10 = scalar_lea.vmem %s1053_s25, 128  ;;  %p1055_p12 = scmp.lt.s32.totalorder %s223_s20, %s1053_s25 }
  0x5a   : > { %p1050_p4 = pnand %p1048_p1, %p1367_p7  ;;  %p1056_p5 = scmp.lt.s32.totalorder %s1054_s10, %s1047_s22 }
  0x5c   : > { %p1051_p11 = pneg %p1050_p4  ;;  %p1057_p3 = por %p1056_p5, %p1055_p12 }
  0x5e   : > { %p1058_p2 = pnand %p1057_p3, %p1051_p11 }
  0x60   : > { %1061 = shalt.err (!%p1058_p2)
}
  0x61   : > { %p1627_p9 = scmp.ne.s32.totalorder %s1620_s21, 0  ;;  %s789_s2 = sshll.u32 %s1210_s0, 10 }
  0x62   : > { %s1628_s16 = sshll.u32 %s1341_s18, 6  ;;  %s1431_s1 = scalar_lea.hbm %s1604_s3, %s789_s2 }
  0x63   : > { %909 = dma.hbm_to_vmem [thread:$0]  (!%p1627_p9), %s1404_s26, 64, %s223_s20, %s211_s27  }
  0x64   : > { %s252_s24 = scalar_lea.vmem [#allocation9], %s1628_s16  ;;  %s1062_s25 = scalar_lea.hbm %s1431_s1, 1024 }
  0x65   : > { %s260_s23 = sshll.u32 %s252_s24, 4  ;;  %p1063_p3 = scmp.ne.s32.totalorder %s1431_s1, %s1062_s25  ;;  %s1433_s23 = int_to_ptr.vmem [resolvable:$true] %s260_s23 }
  0x66   : > { %s1067_s27 = scalar_lea.hbm %s1604_s3, 2048  ;;  %p1068_p6 = scmp.lt.u32.totalorder %s1431_s1, %s1604_s3 }
  0x67   : > { %p1065_p5 = pnand %p1063_p3, %p1367_p7  ;;  %p1069_p8 = scmp.lt.u32.totalorder %s1067_s27, %s1062_s25 }
  0x68   : > { %p1071_p13 = scmp.lt.u32.totalorder %s1062_s25, %s1431_s1 }
  0x69   : > { %p1066_p0 = pneg %p1065_p5  ;;  %p1070_p10 = por %p1069_p8, %p1068_p6 }
  0x6b   : > { %p1072_p1 = por %p1071_p13, %p1070_p10 }
  0x6d   : > { %p1073_p4 = pnand %p1072_p1, %p1066_p0 }
  0x6f   : > { %1076 = shalt.err (!%p1073_p4)
}
  0x70   : > { %s1077_s2 = scalar_lea.vmem %s1433_s23, 1024  ;;  %s1219_s16 = smov [#allocation9]  }
  0x71   : > { %p1078_p11 = scmp.ne.s32.totalorder %s1433_s23, %s1077_s2  ;;  %s1082_s24 = sshll.u32 %s1219_s16, 4  ;;  %s1083_s24 = int_to_ptr.vmem [resolvable:$false] %s1082_s24 }
  0x72   : > { %s1084_s19 = scalar_lea.vmem %s1083_s24, 2048  ;;  %p1085_p3 = scmp.lt.s32.totalorder %s1433_s23, %s1083_s24 }
  0x73   : > { %p1080_p12 = pnand %p1078_p11, %p1367_p7  ;;  %p1086_p5 = scmp.lt.s32.totalorder %s1084_s19, %s1077_s2 }
  0x75   : > { %p1081_p2 = pneg %p1080_p12  ;;  %p1087_p6 = por %p1086_p5, %p1085_p3 }
  0x77   : > { %p1088_p8 = pnand %p1087_p6, %p1081_p2 }
  0x79   : > { %1091 = shalt.err (!%p1088_p8)
}
  0x7a   : > { %s1220_s13 = smov 64   ;;  %s1221_s25 = smov 4  }
  0x7b   : > { %915 = dma.hbm_to_vmem [thread:$0]  (!%p1627_p9), %s1431_s1, 1024, %s1433_s23, %s1361_s9, %s1220_s13, %s1220_s13, %s1221_s25  }
  0x7c   : > { %s764_s26 = sshll.u32 %s1341_s18, 7  ;;  %s790_s20 = sshll.u32 %s1210_s0, 11 }
  0x7d   : > { %s1462_s10 = scalar_lea.hbm %s1605_s4, %s790_s20  ;;  %s274_s2 = scalar_lea.vmem [#allocation10], %s764_s26 }
  0x7e   : > { %s282_s16 = sshll.u32 %s274_s2, 4  ;;  %s271_s24 = scalar_lea.sflag [#allocation11], %s1341_s18  ;;  %s1464_s16 = int_to_ptr.vmem [resolvable:$true] %s282_s16 }
  0x7f   : > { %s1092_s19 = scalar_lea.hbm %s1462_s10, 2048  ;;  %s1097_s23 = scalar_lea.hbm %s1605_s4, 4096 }
  0x80   : > { %p1093_p0 = scmp.ne.s32.totalorder %s1462_s10, %s1092_s19  ;;  %p1098_p1 = scmp.lt.u32.totalorder %s1462_s10, %s1605_s4 }
  0x81   : > { %p1099_p4 = scmp.lt.u32.totalorder %s1097_s23, %s1092_s19  ;;  %p1101_p12 = scmp.lt.u32.totalorder %s1092_s19, %s1462_s10 }
  0x82   : > { %p1095_p10 = pnand %p1093_p0, %p1367_p7 }
  0x83   : > { %p1100_p11 = por %p1099_p4, %p1098_p1 }
  0x84   : > { %p1096_p13 = pneg %p1095_p10 }
  0x85   : > { %p1102_p2 = por %p1101_p12, %p1100_p11 }
  0x87   : > { %p1103_p3 = pnand %p1102_p2, %p1096_p13 }
  0x89   : > { %1106 = shalt.err (!%p1103_p3)
}
  0x8a   : > { %s1107_s26 = scalar_lea.vmem %s1464_s16, 2048  ;;  %s1222_s20 = smov [#allocation10]  }
  0x8b   : > { %p1108_p5 = scmp.ne.s32.totalorder %s1464_s16, %s1107_s26  ;;  %s1112_s27 = sshll.u32 %s1222_s20, 4  ;;  %s1113_s27 = int_to_ptr.vmem [resolvable:$false] %s1112_s27 }
  0x8c   : > { %s1114_s22 = scalar_lea.vmem %s1113_s27, 4096  ;;  %p1115_p0 = scmp.lt.s32.totalorder %s1464_s16, %s1113_s27 }
  0x8d   : > { %p1110_p6 = pnand %p1108_p5, %p1367_p7  ;;  %p1116_p10 = scmp.lt.s32.totalorder %s1114_s22, %s1107_s26 }
  0x8f   : > { %p1111_p8 = pneg %p1110_p6  ;;  %p1117_p1 = por %p1116_p10, %p1115_p0 }
  0x91   : > { %p1118_p4 = pnand %p1117_p1, %p1111_p8 }
  0x93   : > { %1121 = shalt.err (!%p1118_p4)
}
  0x94   : > { %s1223_s2 = smov 128   ;;  %s1224_s19 = smov 8  }
  0x95   : > { %918 = dma.hbm_to_vmem [thread:$0]  (!%p1627_p9), %s1462_s10, 2048, %s1464_s16, %s271_s24, %s1223_s2, %s1223_s2, %s1224_s19  }
  0x96   : > { %p1629_p7 = scmp.ne.s32.totalorder %s1625_s11, 0 }
  0x97   : > { %s1493_s12 = sand.u32 (!%p1629_p7), 1, %s1198_s29   ;;  %p1630_p13 = scmp.ne.s32.totalorder (!%p1629_p7), %s1616_s14, 0 }
  0x98   : > { %294 = sbr.rel (%p1629_p7) target bundleno = 476 (0x1dc), region = 36  ;;  %s768_s1 = sshll.u32 (!%p1629_p7), %s1493_s12, 2 }
  0x99   : > { %s297_s9 = scalar_lea.sflag (!%p1629_p7), [#allocation5], %s1493_s12  ;;  %s1497_s23 = scalar_lea.vmem (!%p1629_p7), [#allocation4], %s768_s1 }
  0x9f   : > { %1177 = dma.done.wait (%p1630_p13), %s297_s9, 64  }
  0xa0   : > { %1179 = vsyncadd (%p1630_p13), %s297_s9, 4294967232  ;;  %s305_s18 = sand.u32 1, %s1303_s8   ;;  %s769_s21 = sshll.u32 %s1493_s12, 3 }
  0xa1   : > { %s306_s11 = scalar_lea.sflag [#allocation8], %s305_s18  ;;  %s1505_s10 = scalar_lea.vmem [#allocation7], %s769_s21 }
  0xa2   : > { %1181 = dma.done.wait (%p1630_p13), %s306_s11, 1152  }
  0xa3   : > { %1183 = vsyncadd (%p1630_p13), %s306_s11, 4294966144  ;;  %s770_s16 = sshll.u32 %s1493_s12, 6  ;;  %s771_s24 = sshll.u32 %s1493_s12, 7 }
  0xa4   : > { %s1513_s13 = scalar_lea.vmem [#allocation9], %s770_s16  ;;  %s324_s25 = scalar_lea.sflag [#allocation11], %s1493_s12 }
  0xa5   : > { %s1516_s26 = scalar_lea.vmem [#allocation10], %s771_s24 }
  0xa6   : > { %1185 = dma.done.wait (%p1630_p13), %s324_s25, 2048  }
  0xa7   : > { %1187 = vsyncadd (%p1630_p13), %s324_s25, 4294965248  ;;  %s368_s8 = sld [smem:[#allocation3 + %s1206_s6]]  ;;  %s1523_s20 = scalar_lea.vmem [#allocation12], %s768_s1 }
  0xad   : > { %p774_p9 = scmp.gt.s32.totalorder %s368_s8, 0 }
  0xae   : > { %v1225_v0 = vmov (!%p774_p9), 0  }
  0xaf   : > { %373 = sbr.rel (%p774_p9) target bundleno = 182 (0xb6), region = 56  ;;  %374 = vst [vmem:[%s1523_s20] sm:$0xf] (!%p774_p9), %v1225_v0 }
  0xb6 PF: > { %p776_p11 = scmp.le.s32.totalorder %s368_s8, 0 }
  0xb7   : > { %v485_v1 = vld [vmem:[%s1516_s26] sm:$0xff] (!%p776_p11)  ;;  %v486_v2 = vld [vmem:[%s1516_s26 + $0x8] sm:$0xff] (!%p776_p11)  ;;  %v487_v3 = vld [vmem:[%s1516_s26 + $0x10] sm:$0xff] (!%p776_p11)  ;;  %v1226_v4 = vmov (!%p776_p11), 0.0|0.0   ;;  %v1227_v7 = vmov (!%p776_p11), 0.0   ;;  %vm1228_vm0 = vmmov (!%p776_p11), 0  }
  0xb8   : > { %378 = sbr.rel (%p776_p11) target bundleno = 451 (0x1c3), region = 60  ;;  %872 = vmatprep.subr.bf16.mxu1 (!%p776_p11), %v1226_v4  ;;  %v873_v5 = vpack.c.bf16 (!%p776_p11), %v486_v2, %v485_v1  ;;  %v488_v6 = vld [vmem:[%s1516_s26 + $0x18] sm:$0xff] (!%p776_p11)  ;;  %817 = vmatprep.subr.bf16.mxu0 (!%p776_p11), %v1227_v7  ;;  %v489_v9 = vld [vmem:[%s1516_s26 + $0x20] sm:$0xff] (!%p776_p11)  ;;  %v490_v11 = vld [vmem:[%s1516_s26 + $0x28] sm:$0xff] (!%p776_p11) }
  0xb9   : > { %869 = vmatprep.mubr.msk.f32.mxu1 (!%p776_p11), %vm1228_vm0, %v1227_v7  ;;  %833 = vmatprep.mubr.msk.bf16.mxu0 (!%p776_p11), %vm1228_vm0, %v1227_v7  ;;  %v876_v8 = vpack.c.bf16 (!%p776_p11), %v488_v6, %v487_v3  ;;  %v982_v10 = vld [vmem:[%s1513_s13] sm:$0xff] (!%p776_p11)   ;;  %v983_v12 = vld [vmem:[%s1513_s13 + $0x8] sm:$0xff] (!%p776_p11)   ;;  %v879_v13 = vpack.c.bf16 (!%p776_p11), %v490_v11, %v489_v9  ;;  %v491_v14 = vld [vmem:[%s1516_s26 + $0x30] sm:$0xff] (!%p776_p11) }
  0xba   : > { %874 = vmatpush3.bf16.msra.mxu1 (!%p776_p11), %v873_v5  ;;  %818 = vmatpush3.bf16.msra.mxu0 (!%p776_p11), %v982_v10  ;;  %v492_v15 = vld [vmem:[%s1516_s26 + $0x38] sm:$0xff] (!%p776_p11)  ;;  %v984_v16 = vld [vmem:[%s1513_s13 + $0x10] sm:$0xff] (!%p776_p11)   ;;  %v493_v18 = vld [vmem:[%s1516_s26 + $0x40] sm:$0xff] (!%p776_p11) }
  0xbb   : > { %875 = vmatprep.subr.bf16.mxu1 (!%p776_p11), %v1226_v4  ;;  %819 = vmatprep.subr.bf16.mxu0 (!%p776_p11), %v1227_v7  ;;  %v882_v17 = vpack.c.bf16 (!%p776_p11), %v492_v15, %v491_v14  ;;  %v494_v19 = vld [vmem:[%s1516_s26 + $0x48] sm:$0xff] (!%p776_p11)  ;;  %v985_v20 = vld [vmem:[%s1513_s13 + $0x18] sm:$0xff] (!%p776_p11)   ;;  %v495_v22 = vld [vmem:[%s1516_s26 + $0x50] sm:$0xff] (!%p776_p11) }
  0xbc   : > { %v885_v21 = vpack.c.bf16 (!%p776_p11), %v494_v19, %v493_v18  ;;  %v496_v23 = vld [vmem:[%s1516_s26 + $0x58] sm:$0xff] (!%p776_p11)  ;;  %v986_v24 = vld [vmem:[%s1513_s13 + $0x20] sm:$0xff] (!%p776_p11)   ;;  %v498_v27 = vld [vmem:[%s1516_s26 + $0x68] sm:$0xff] (!%p776_p11) }
  0xbd   : > { %v888_v25 = vpack.c.bf16 (!%p776_p11), %v496_v23, %v495_v22  ;;  %v497_v26 = vld [vmem:[%s1516_s26 + $0x60] sm:$0xff] (!%p776_p11)  ;;  %v987_v28 = vld [vmem:[%s1513_s13 + $0x28] sm:$0xff] (!%p776_p11)   ;;  %v499_v30 = vld [vmem:[%s1516_s26 + $0x70] sm:$0xff] (!%p776_p11) }
  0xbe   : > { %877 = vmatpush3.bf16.msra.mxu1 (!%p776_p11), %v876_v8  ;;  %820 = vmatpush3.bf16.msra.mxu0 (!%p776_p11), %v983_v12  ;;  %v891_v29 = vpack.c.bf16 (!%p776_p11), %v498_v27, %v497_v26  ;;  %v500_v31 = vld [vmem:[%s1516_s26 + $0x78] sm:$0xff] (!%p776_p11)  ;;  %v988_v32 = vld [vmem:[%s1513_s13 + $0x30] sm:$0xff] (!%p776_p11)   ;;  %v379_v36 = vld [vmem:[%s1497_s23] sm:$0xf] (!%p776_p11) }
  0xbf   : > { %878 = vmatprep.subr.bf16.mxu1 %v1226_v4  ;;  %821 = vmatprep.subr.bf16.mxu0 %v1227_v7  ;;  %v894_v33 = vpack.c.bf16 %v500_v31, %v499_v30  ;;  %v989_v34 = vld [vmem:[%s1513_s13 + $0x38] sm:$0xff]  }
  0xc0   : > { %v484_v35 = vld [vmem:[%s1505_s10] sm:$0xff] }
  0xc2   : > { %880 = vmatpush3.bf16.msra.mxu1 %v879_v13  ;;  %822 = vmatpush3.bf16.msra.mxu0 %v984_v16 }
  0xc3   : > { %881 = vmatprep.subr.bf16.mxu1 %v1226_v4  ;;  %823 = vmatprep.subr.bf16.mxu0 %v1227_v7 }
  0xc6   : > { %883 = vmatpush3.bf16.msra.mxu1 %v882_v17  ;;  %824 = vmatpush3.bf16.msra.mxu0 %v985_v20 }
  0xc7   : > { %884 = vmatprep.subr.bf16.mxu1 %v1226_v4  ;;  %825 = vmatprep.subr.bf16.mxu0 %v1227_v7 }
  0xca   : > { %886 = vmatpush3.bf16.msra.mxu1 %v885_v21  ;;  %826 = vmatpush3.bf16.msra.mxu0 %v986_v24 }
  0xcb   : > { %887 = vmatprep.subr.bf16.mxu1 %v1226_v4  ;;  %827 = vmatprep.subr.bf16.mxu0 %v1227_v7 }
  0xce   : > { %889 = vmatpush3.bf16.msra.mxu1 %v888_v25  ;;  %828 = vmatpush3.bf16.msra.mxu0 %v987_v28 }
  0xcf   : > { %890 = vmatprep.subr.bf16.mxu1 %v1226_v4  ;;  %829 = vmatprep.subr.bf16.mxu0 %v1227_v7 }
  0xd2   : > { %892 = vmatpush3.bf16.msra.mxu1 %v891_v29  ;;  %830 = vmatpush3.bf16.msra.mxu0 %v988_v32 }
  0xd3   : > { %893 = vmatprep.subr.bf16.mxu1 %v1226_v4  ;;  %831 = vmatprep.subr.bf16.mxu0 %v1227_v7 }
  0xd6   : > { %895 = vmatpush3.bf16.msra.mxu1 %v894_v33  ;;  %832 = vmatpush3.bf16.msra.mxu0 %v989_v34 }
  0xd9   : > { %870 = vmatmul.mubr.f32.vlgmr.msra.gmra.mrb[0].mxu1 %v484_v35  ;;  %834 = vmatmul.mubr.bf16.vlgmr.msra.gmra.mrb[0].mxu0 %v379_v36 }
 0x1ac   : > { %v567_v37 = vpop.f32.mrb[0].mxu1  ;;  %v478_v40 = vpop.f32.mrb[0].mxu0 }
 0x1ad   : > { %v571_v38 = vmax.f32 %v567_v37, 0.0  ;;  %v871_v39 = vpop.f32.mrb[1].mxu1  ;;  %v835_v41 = vpop.f32.mrb[1].mxu0 }
 0x1ae   : > { %v481_v42 = vpop.f32.mrb[2].mxu0 }
 0x1af   : > { %990 = vrsqrt.f32 %v571_v38  ;;  %v836_v43 = vpop.f32.mrb[3].mxu0  ;;  %vm574_vm1 = vcmp.eq.f32.partialorder %v571_v38, inf  ;;  %v577_v46 = vand.u32 2147483648, %v571_v38  ;;  %vm576_vm2 = vcmp.eq.f32.partialorder %v571_v38, 0.0 }
 0x1b9   : > { %v991_v44 = vpop.eup %990 }
 0x1ba   : > { %v573_v45 = vmul.f32 %v991_v44, %v571_v38 }
 0x1bc   : > { %v575_v47 = vsel %vm574_vm1, %v571_v38, %v573_v45 }
 0x1bd   : > { %v578_v48 = vsel %vm576_vm2, %v577_v46, %v575_v47 }
 0x1be   : > { %v579_v49 = vsub.f32 %v578_v48, %v478_v40 }
 0x1c0   : > { %v580_v50 = vpack.c.bf16 %v579_v49, %v579_v49 }
 0x1c2   : > { %581 = vst [vmem:[%s1523_s20] sm:$0xf] %v580_v50 }
 0x1c3 PF: > { %s786_s14 = sshll.u32 %s1206_s6, 6  ;;  %s598_s19 = sshll.u32 %s1523_s20, 4  ;;  %s599_s19 = int_to_ptr.vmem [resolvable:$true] %s598_s19 }
 0x1c4   : > { %s1557_s2 = scalar_lea.hbm %s1606_s5, %s786_s14  ;;  %s583_s1 = scalar_lea.sflag [#allocation6], %s1493_s12 }
 0x1c5   : > { %s1122_s9 = scalar_lea.vmem %s599_s19, 64  ;;  %p1631_p2 = scmp.ne.s32.totalorder %s1617_s15, 0 }
 0x1c6   : > { %p1123_p12 = scmp.ne.s32.totalorder %s599_s19, %s1122_s9  ;;  %s1229_s23 = smov [#allocation12]  }
 0x1c7   : > { %s1126_s18 = sshll.u32 %s1229_s23, 4  ;;  %s1127_s18 = int_to_ptr.vmem [resolvable:$false] %s1126_s18 }
 0x1c8   : > { %p1124_p3 = pnand %p1123_p12, %p1631_p2  ;;  %s1128_s21 = scalar_lea.vmem %s1127_s18, 128 }
 0x1c9   : > { %p1129_p6 = scmp.lt.s32.totalorder %s599_s19, %s1127_s18  ;;  %p1130_p8 = scmp.lt.s32.totalorder %s1128_s21, %s1122_s9 }
 0x1ca   : > { %p1125_p5 = pneg %p1124_p3 }
 0x1cb   : > { %p1131_p0 = por %p1130_p8, %p1129_p6 }
 0x1cd   : > { %p1132_p10 = pnand %p1131_p0, %p1125_p5 }
 0x1cf   : > { %1135 = shalt.err (!%p1132_p10)
}
 0x1d0   : > { %s1136_s6 = scalar_lea.hbm %s1557_s2, 64  ;;  %s1140_s10 = scalar_lea.hbm %s1606_s5, 128 }
 0x1d1   : > { %p1137_p1 = scmp.ne.s32.totalorder %s1557_s2, %s1136_s6  ;;  %p1141_p13 = scmp.lt.u32.totalorder %s1557_s2, %s1606_s5 }
 0x1d2   : > { %p1142_p9 = scmp.lt.u32.totalorder %s1140_s10, %s1136_s6  ;;  %p1144_p12 = scmp.lt.u32.totalorder %s1136_s6, %s1557_s2 }
 0x1d3   : > { %p1138_p4 = pnand %p1137_p1, %p1631_p2 }
 0x1d4   : > { %p1143_p11 = por %p1142_p9, %p1141_p13 }
 0x1d5   : > { %p1139_p7 = pneg %p1138_p4 }
 0x1d6   : > { %p1145_p3 = por %p1144_p12, %p1143_p11 }
 0x1d8   : > { %p1146_p5 = pnand %p1145_p3, %p1139_p7 }
 0x1da   : > { %1149 = shalt.err (!%p1146_p5)
}
 0x1db   : > { %904 = dma.vmem_to_hbm [thread:$0]  (%p1631_p2), %s599_s19, 64, %s1557_s2, %s583_s1  }
 0x1dc PF: > { %s610_s13 = sand.u32 1, %s1194_s28   ;;  %p1632_p6 = scmp.ne.s32.totalorder %s1619_s17, 0 }
 0x1dd   : > { %p1633_p8 = scmp.ge.s32.totalorder %s1214_s7, 2  ;;  %s611_s25 = scalar_lea.sflag [#allocation6], %s610_s13 }
 0x1df   : > { %p920_p0 = pnand %p1633_p8, %p1632_p6 }
 0x1e1   : > { %1189 = dma.done.wait (!%p920_p0), %s611_s25, 64  }
 0x1e2   : > { %1191 = vsyncadd (!%p920_p0), %s611_s25, 4294967232  ;;  %s31_s7 = sadd.s32 1, %s1214_s7   ;;  %s1634_s26 = sld [smem:[#allocation19_spill]] }
 0x1e3   : > { %p28_p10 = scmp.ge.s32.totalorder %s31_s7, 4   ;;  %s1635_s15 = sld [smem:[#allocation18_spill]] }
 0x1e4   : > { %s1636_s28 = smov %s1198_s29  ;;  %s1637_s29 = smov %s1202_s30 }
 0x1e5   : > { %s1639_s6 = smov %s1210_s0  ;;  %30 = sbr.rel (!%p28_p10) target bundleno = 23 (0x17), region = 126 }
 0x1e8   : > { %s1638_s30 = smov %s1634_s26 }
 0x1e9   : > { %s1640_s0 = smov %s1635_s15 }
 0x1ec   :  { %616 = vsyncpa [#allocation5], 1 }
 0x1ed   :  { %618 = vsyncpa [#allocation5 + $0x1], 1 }
 0x1ee   :  { %619 = vsyncpa [#allocation8], 1 }
 0x1ef   :  { %621 = vsyncpa [#allocation8 + $0x1], 1 }
 0x1f0   :  { %622 = vsyncpa [#allocation11], 1 }
 0x1f1   :  { %624 = vsyncpa [#allocation11 + $0x1], 1 }
 0x1f2   :  { %625 = vsyncpa [#allocation6], 1 }
 0x1f3   :  { %627 = vsyncpa [#allocation6 + $0x1], 1 }

</bundles_post_ra>
